<compile_context>
chip_gen: v5e
topology: v5e:2x2
jax: 0.10.0
libtpu: 0.0.40
codegen_flags: <defaults>
</compile_context>

<pallas_src>
import functools
from typing import NamedTuple

import jax
import jax.numpy as jnp
from jax.experimental import pallas as pl
from jax.experimental.pallas import tpu as pltpu

LANE = 128     # vreg lane width (last dim)
SUBLANE = 8    # vreg sublane width (second-last dim)


def _round_up(n, m):
    return ((n + m - 1) // m) * m


def _pad2(a, rows, cols):
    r, c = a.shape
    return jnp.pad(a, ((0, rows - r), (0, cols - c)))


class DQNMeta(NamedTuple):
    input_dims: int
    n_actions: int
    kp: int          # common padded hidden width (fc1/fc2 -> multiple of 128)
    ap: int          # padded action width (multiple of 128)
    use_bf16: bool


# ---------------------------------------------------------------------------
# Kernel
# ---------------------------------------------------------------------------
def dqn_kernel(x_ref, w1_ref, w23_ref, b_ref, o_ref):
    KP = w1_ref.shape[1]          # padded hidden width
    Ap = o_ref.shape[1]           # padded action width
    cdt = w1_ref.dtype            # matmul operand dtype (bf16 fast path / f32)

    x = x_ref[...]                # (TB, D), D = true input width (no lane pad)

    # fc1 + ReLU : f32 MXU accumulation, f32 bias-add / ReLU on the VPU.
    h1 = jnp.dot(x, w1_ref[...], preferred_element_type=jnp.float32)
    h1 = jnp.maximum(h1 + b_ref[:, 0:KP], 0.0)

    # fc2 + ReLU : w2 is the first KP lanes of the packed w2|w3 buffer.
    h2 = jnp.dot(h1.astype(cdt), w23_ref[:, 0:KP],
                 preferred_element_type=jnp.float32)
    h2 = jnp.maximum(h2 + b_ref[:, KP:2 * KP], 0.0)

    # fc3 (no activation -> Q-values).
    o = jnp.dot(h2.astype(cdt), w23_ref[:, KP:KP + Ap],
                preferred_element_type=jnp.float32)
    o_ref[...] = (o + b_ref[:, 2 * KP:2 * KP + Ap]).astype(o_ref.dtype)


# ---------------------------------------------------------------------------
# One-time parameter preparation (pad + cast + pack) -- hoisted out of forward
# ---------------------------------------------------------------------------
def prepare_params(params, *, use_bf16=True):
    w1, b1 = params["w1"], params["b1"]
    w2, b2 = params["w2"], params["b2"]
    w3, b3 = params["w3"], params["b3"]

    D, F1 = w1.shape
    F2 = w2.shape[1]
    A = w3.shape[1]

    KP = _round_up(max(F1, F2), LANE)
    Ap = _round_up(A, LANE)
    cdt = jnp.bfloat16 if use_bf16 else jnp.float32

    # Zero padding is exact: padded weight columns/rows contribute 0 to every
    # dot product, padded bias lanes are 0, and ReLU(0) = 0.
    w1p = _pad2(w1, D, KP).astype(cdt)                         # (D, KP)
    w23p = jnp.concatenate(
        [_pad2(w2, KP, KP), _pad2(w3, KP, Ap)], axis=1).astype(cdt)  # (KP, KP+Ap)
    bp = jnp.concatenate(
        [_pad2(b1, 1, KP), _pad2(b2, 1, KP), _pad2(b3, 1, Ap)],
        axis=1).astype(jnp.float32)                            # (1, 2*KP+Ap)

    bufs = {"w1": w1p, "w23": w23p, "b": bp}
    meta = DQNMeta(input_dims=D, n_actions=A, kp=KP, ap=Ap, use_bf16=use_bf16)
    return bufs, meta


# ---------------------------------------------------------------------------
# Forward
# ---------------------------------------------------------------------------
@functools.partial(jax.jit, static_argnums=(2, 3))
def dqn_forward(x, bufs, meta, max_block_b=512):
    """x: [B, input_dims] f32.  bufs/meta: from prepare_params.
    Returns [B, n_actions] f32 Q-values."""
    B, D = x.shape
    assert D == meta.input_dims
    KP, Ap, A = meta.kp, meta.ap, meta.n_actions
    cdt = jnp.bfloat16 if meta.use_bf16 else jnp.float32

    # Balanced batch tiling: cap padding waste at <8 rows; force >=2 tiles for
    # large B so v7x's two TensorCores actually split the batch.
    num_tiles = pl.cdiv(B, max_block_b)
    if num_tiles == 1 and B >= 256:
        num_tiles = 2
    TB = _round_up(pl.cdiv(B, num_tiles), SUBLANE)
    Bp = TB * num_tiles

    # Pad batch rows only; the lane (feature) dim of x stays at its true width.
    # Padded rows compute bias/ReLU garbage that is sliced off below.
    xp = jnp.pad(x, ((0, Bp - B), (0, 0))).astype(cdt)

    # bf16 output halves store/writeback traffic (A padded to 128 lanes);
    # the f32 parity path keeps an f32 output.
    out_dtype = cdt

    # Resident operands: full-array block, constant index_map -> one DMA,
    # VMEM-resident across the whole batch sweep.
    resident = lambda a: pl.BlockSpec(a.shape, lambda i: (0, 0))

    itemsize = jnp.dtype(cdt).itemsize
    flops = 2 * Bp * (D * KP + KP * KP + KP * Ap)
    bytes_accessed = (
        Bp * D * itemsize                          # streamed x
        + D * KP * itemsize                        # w1
        + KP * (KP + Ap) * itemsize                # packed w2|w3
        + (2 * KP + Ap) * 4                        # packed biases (f32)
        + Bp * Ap * jnp.dtype(out_dtype).itemsize  # output
    )

    out = pl.pallas_call(
        dqn_kernel,
        out_shape=jax.ShapeDtypeStruct((Bp, Ap), out_dtype),
        grid_spec=pltpu.PrefetchScalarGridSpec(
            num_scalar_prefetch=0,
            grid=(num_tiles,),
            in_specs=[
                pl.BlockSpec((TB, D), lambda i: (i, 0)),   # x streamed over B
                resident(bufs["w1"]),
                resident(bufs["w23"]),
                resident(bufs["b"]),
            ],
            out_specs=pl.BlockSpec((TB, Ap), lambda i: (i, 0)),
        ),
        compiler_params=pltpu.CompilerParams(
            dimension_semantics=("parallel",),   # v7x: shard batch over 2 TCs
        ),
        cost_estimate=pl.CostEstimate(
            flops=flops, transcendentals=0, bytes_accessed=bytes_accessed
        ),
    )(xp, bufs["w1"], bufs["w23"], bufs["b"])

    return out[:B, :A].astype(jnp.float32)


# ---------------------------------------------------------------------------
# Init + reference (for correctness checks)
# ---------------------------------------------------------------------------
def init_params(key, input_dims, fc1_dims, fc2_dims, n_actions):
    """Deterministic init mimicking nn.Linear's U(-1/sqrt(fan_in), 1/sqrt(fan_in))."""
    ks = jax.random.split(key, 6)

    def lin(kw, kb, fan_in, fan_out):
        bound = 1.0 / jnp.sqrt(float(fan_in))
        w = jax.random.uniform(kw, (fan_in, fan_out), jnp.float32, -bound, bound)
        b = jax.random.uniform(kb, (1, fan_out), jnp.float32, -bound, bound)
        return w, b

    w1, b1 = lin(ks[0], ks[1], input_dims, fc1_dims)
    w2, b2 = lin(ks[2], ks[3], fc1_dims, fc2_dims)
    w3, b3 = lin(ks[4], ks[5], fc2_dims, n_actions)
    return {"w1": w1, "b1": b1, "w2": w2, "b2": b2, "w3": w3, "b3": b3}


def dqn_reference(x, p, compute_dtype=jnp.float32):
    """Plain-JAX reference of the PyTorch forward (operands cast to
    compute_dtype, f32 accumulation, HIGHEST-precision dots)."""
    cdt = compute_dtype
    hi = jax.lax.Precision.HIGHEST
    h1 = jnp.maximum(
        jnp.dot(x.astype(cdt), p["w1"].astype(cdt),
                preferred_element_type=jnp.float32, precision=hi) + p["b1"], 0.0)
    h2 = jnp.maximum(
        jnp.dot(h1.astype(cdt), p["w2"].astype(cdt),
                preferred_element_type=jnp.float32, precision=hi) + p["b2"], 0.0)
    return jnp.dot(h2.astype(cdt), p["w3"].astype(cdt),
                   preferred_element_type=jnp.float32, precision=hi) + p["b3"]


if __name__ == "__main__":
    # Small shapes consistent with DeepQNetwork(lr, input_dims=16, fc1_dims=32,
    # fc2_dims=32, n_actions=8) applied to a batch of 8 states.
    batch, input_dims, fc1_dims, fc2_dims, n_actions = 8, 16, 32, 32, 8

    key = jax.random.PRNGKey(0)
    k_x, k_p = jax.random.split(key)
    x = jax.random.normal(k_x, (batch, input_dims), jnp.float32)
    params = init_params(k_p, input_dims, fc1_dims, fc2_dims, n_actions)

    ref_f32 = dqn_reference(x, params, jnp.float32)

    # 1) Full-f32 path: parity with the PyTorch-style reference (tolerance
    #    covers any MXU multi-pass vs. HIGHEST rounding differences).
    bufs32, meta32 = prepare_params(params, use_bf16=False)
    out_f32 = dqn_forward(x, bufs32, meta32, 512)
    jax.block_until_ready(out_f32)
    assert out_f32.shape == (batch, n_actions)
    assert jnp.allclose(out_f32, ref_f32, atol=1e-3, rtol=1e-3)

    # 2) bf16-operand fast path (default): compare against a bf16-operand
    #    reference (bf16 matmul inputs, f32 accumulation) with relaxed
    #    tolerance; the kernel additionally stores its output in bf16.
    bufs16, meta16 = prepare_params(params, use_bf16=True)
    out_bf16 = dqn_forward(x, bufs16, meta16, 512)
    jax.block_until_ready(out_bf16)
    ref_bf16 = dqn_reference(x, params, jnp.bfloat16)
    assert out_bf16.shape == (batch, n_actions)
    assert jnp.allclose(out_bf16, ref_bf16, atol=2e-2, rtol=2e-2)

    print("KERNEL_OK")
</pallas_src>

<mosaic_0001>
module attributes {stable_mosaic.version = 11 : i64} {
  func.func @dqn_kernel(%arg0: i32, %arg1: memref<8x16xf32, #tpu.memory_space<vmem>>, %arg2: memref<16x128xf32, #tpu.memory_space<vmem>>, %arg3: memref<128x256xf32, #tpu.memory_space<vmem>>, %arg4: memref<1x384xf32, #tpu.memory_space<vmem>>, %arg5: memref<8x128xf32, #tpu.memory_space<vmem>>) attributes {dimension_semantics = [#tpu.dimension_semantics<parallel>], iteration_bounds = array<i64: 1>, scalar_prefetch = 0 : i64, scratch_operands = 0 : i64, tpu.core_type = #tpu.core_type<tc>, window_params = [{transform_indices = @transform_0, window_bounds = array<i64: 8, 16>}, {pipeline_mode = #tpu.pipeline_mode<synchronous>, transform_indices = @transform_1, window_bounds = array<i64: 16, 128>}, {pipeline_mode = #tpu.pipeline_mode<synchronous>, transform_indices = @transform_2, window_bounds = array<i64: 128, 256>}, {pipeline_mode = #tpu.pipeline_mode<synchronous>, transform_indices = @transform_3, window_bounds = array<i64: 1, 384>}, {transform_indices = @transform_4, window_bounds = array<i64: 8, 128>}]} {
    %c0 = arith.constant 0 : index
    %c0_0 = arith.constant 0 : index
    %0 = vector.load %arg1[%c0, %c0_0] : memref<8x16xf32, #tpu.memory_space<vmem>>, vector<8x16xf32>
    %c0_1 = arith.constant 0 : index
    %c0_2 = arith.constant 0 : index
    %1 = vector.load %arg2[%c0_1, %c0_2] : memref<16x128xf32, #tpu.memory_space<vmem>>, vector<16x128xf32>
    %cst = arith.constant dense<0.000000e+00> : vector<8x128xf32>
    %2 = tpu.matmul %0, %1, %cst {dimension_numbers = #tpu.dot_dimension_numbers<[1], [0], [0], [1], [0, 0, 1, 1], [], []>} : vector<8x16xf32>, vector<16x128xf32>, vector<8x128xf32> -> vector<8x128xf32>
    %c0_3 = arith.constant 0 : index
    %c0_4 = arith.constant 0 : index
    %3 = vector.load %arg4[%c0_3, %c0_4] : memref<1x384xf32, #tpu.memory_space<vmem>>, vector<1x128xf32>
    %4 = vector.broadcast %3 : vector<1x128xf32> to vector<8x128xf32>
    %5 = arith.addf %2, %4 : vector<8x128xf32>
    %cst_5 = arith.constant 0.000000e+00 : f32
    %6 = vector.broadcast %cst_5 : f32 to vector<8x128xf32>
    %7 = arith.maximumf %5, %6 : vector<8x128xf32>
    %c0_6 = arith.constant 0 : index
    %c0_7 = arith.constant 0 : index
    %8 = vector.load %arg3[%c0_6, %c0_7] : memref<128x256xf32, #tpu.memory_space<vmem>>, vector<128x128xf32>
    %cst_8 = arith.constant dense<0.000000e+00> : vector<8x128xf32>
    %9 = tpu.matmul %7, %8, %cst_8 {dimension_numbers = #tpu.dot_dimension_numbers<[1], [0], [0], [1], [0, 0, 1, 1], [], []>} : vector<8x128xf32>, vector<128x128xf32>, vector<8x128xf32> -> vector<8x128xf32>
    %c0_9 = arith.constant 0 : index
    %c128 = arith.constant 128 : index
    %10 = vector.load %arg4[%c0_9, %c128] : memref<1x384xf32, #tpu.memory_space<vmem>>, vector<1x128xf32>
    %11 = vector.broadcast %10 : vector<1x128xf32> to vector<8x128xf32>
    %12 = arith.addf %9, %11 : vector<8x128xf32>
    %cst_10 = arith.constant 0.000000e+00 : f32
    %13 = vector.broadcast %cst_10 : f32 to vector<8x128xf32>
    %14 = arith.maximumf %12, %13 : vector<8x128xf32>
    %c0_11 = arith.constant 0 : index
    %c128_12 = arith.constant 128 : index
    %15 = vector.load %arg3[%c0_11, %c128_12] : memref<128x256xf32, #tpu.memory_space<vmem>>, vector<128x128xf32>
    %cst_13 = arith.constant dense<0.000000e+00> : vector<8x128xf32>
    %16 = tpu.matmul %14, %15, %cst_13 {dimension_numbers = #tpu.dot_dimension_numbers<[1], [0], [0], [1], [0, 0, 1, 1], [], []>} : vector<8x128xf32>, vector<128x128xf32>, vector<8x128xf32> -> vector<8x128xf32>
    %c0_14 = arith.constant 0 : index
    %c256 = arith.constant 256 : index
    %17 = vector.load %arg4[%c0_14, %c256] : memref<1x384xf32, #tpu.memory_space<vmem>>, vector<1x128xf32>
    %18 = vector.broadcast %17 : vector<1x128xf32> to vector<8x128xf32>
    %19 = arith.addf %16, %18 : vector<8x128xf32>
    %c0_15 = arith.constant 0 : index
    %c0_16 = arith.constant 0 : index
    %20 = vector.load %arg5[%c0_15, %c0_16] : memref<8x128xf32, #tpu.memory_space<vmem>>, vector<8x128xf32>
    tpu.vector_store %arg5[%c0_15, %c0_16], %19 {strides = array<i32>} : memref<8x128xf32, #tpu.memory_space<vmem>>, vector<8x128xf32>,
    return
  }
  func.func @transform_0(%arg0: i32) -> (i32, i32) {
    %c0_i32 = arith.constant 0 : i32
    %c0_i32_0 = arith.constant 0 : i32
    return %arg0, %c0_i32 : i32, i32
  }
  func.func @transform_1(%arg0: i32) -> (i32, i32) {
    %c0_i32 = arith.constant 0 : i32
    %c0_i32_0 = arith.constant 0 : i32
    %c0_i32_1 = arith.constant 0 : i32
    return %c0_i32, %c0_i32_0 : i32, i32
  }
  func.func @transform_2(%arg0: i32) -> (i32, i32) {
    %c0_i32 = arith.constant 0 : i32
    %c0_i32_0 = arith.constant 0 : i32
    %c0_i32_1 = arith.constant 0 : i32
    return %c0_i32, %c0_i32_0 : i32, i32
  }
  func.func @transform_3(%arg0: i32) -> (i32, i32) {
    %c0_i32 = arith.constant 0 : i32
    %c0_i32_0 = arith.constant 0 : i32
    %c0_i32_1 = arith.constant 0 : i32
    return %c0_i32, %c0_i32_0 : i32, i32
  }
  func.func @transform_4(%arg0: i32) -> (i32, i32) {
    %c0_i32 = arith.constant 0 : i32
    %c0_i32_0 = arith.constant 0 : i32
    return %arg0, %c0_i32 : i32, i32
  }
}

</mosaic_0001>

<bundles_post_ra>
// kernel: dqn_forward.1
= control target key start
LH: loop header
LB: loop body
LE: loop exit
PB: predicated region body
PF: predicated region fallthrough
CT: control target
= control target key end

     0   :  { %9 = vsyncpa [#allocation3], 0  ;;  %s400_s0 = inlined_call_operand.hbm [shape: f32[8,16], index: 0, kind: input, shape index: {}]   ;;  %s401_s1 = inlined_call_operand.hbm [shape: f32[16,128], index: 1, kind: input, shape index: {}]   ;;  %s402_s2 = inlined_call_operand.hbm [shape: f32[128,256], index: 2, kind: input, shape index: {}]   ;;  %s403_s3 = inlined_call_operand.hbm [shape: f32[1,384], index: 3, kind: input, shape index: {}]   ;;  %s404_s4 = inlined_call_operand.hbm [shape: f32[8,128], index: 4, kind: output, shape index: {}]  }
   0x1   :  { %10 = vsyncpa [#allocation6], 0 }
   0x2   :  { %11 = vsyncpa [#allocation9], 0  ;;  %s28_s17 = sshll.u32 %s401_s1, 4  ;;  %s29_s17 = int_to_ptr.hbm [resolvable:$true] %s28_s17 }
   0x3   :  { %12 = vsyncpa [#allocation4], 0  ;;  %s351_s18 = smov [#allocation5]   ;;  %s18_s22 = sshll.u32 %s400_s0, 4  ;;  %s19_s22 = int_to_ptr.hbm [resolvable:$true] %s18_s22 }
   0x4   :  { %s30_s19 = sshll.u32 %s351_s18, 4  ;;  %s352_s23 = smov 128   ;;  %s31_s19 = int_to_ptr.vmem [resolvable:$true] %s30_s19 }
   0x5   :  { %s353_s24 = smov 8   ;;  %s354_s25 = smov [#allocation2]  }
   0x6   :  { %36 = dma.hbm_to_vmem [thread:$0]  %s29_s17, 256, %s31_s19, [#allocation6], %s352_s23, %s352_s23, %s353_s24  }
   0x7   :  { %s20_s26 = sshll.u32 %s354_s25, 4  ;;  %s41_s29 = sshll.u32 %s402_s2, 4  ;;  %s21_s26 = int_to_ptr.vmem [resolvable:$true] %s20_s26  ;;  %s42_s29 = int_to_ptr.hbm [resolvable:$true] %s41_s29 }
   0x8   :  { %23 = dma.hbm_to_vmem [thread:$0]  %s19_s22, 128, %s21_s26, [#allocation3]  }
   0x9   :  { %s355_s1 = smov [#allocation7]   ;;  %s55_s0 = sshll.u32 %s403_s3, 4  ;;  %s56_s0 = int_to_ptr.hbm [resolvable:$true] %s55_s0 }
   0xa   :  { %s43_s30 = sshll.u32 %s355_s1, 4  ;;  %s356_s7 = smov 256   ;;  %s44_s30 = int_to_ptr.vmem [resolvable:$true] %s43_s30 }
   0xb   :  { %s357_s8 = smov 16   ;;  %s358_s9 = smov [#allocation8]  }
   0xc   :  { %49 = dma.hbm_to_vmem [thread:$0]  %s42_s29, 4096, %s44_s30, [#allocation6], %s356_s7, %s356_s7, %s357_s8  }
   0xd   :  { %s57_s10 = sshll.u32 %s358_s9, 4  ;;  %s58_s10 = int_to_ptr.vmem [resolvable:$true] %s57_s10 }
   0xe   :  { %60 = dma.hbm_to_vmem [thread:$0]  %s56_s0, 48, %s58_s10, [#allocation9]  }
   0xf   :  { %343 = dma.done.wait [#allocation3], 128  }
  0x10   :  { %344 = vsyncadd [#allocation3], 4294967168 }
  0x11   :  { %345 = dma.done.wait [#allocation6], 4352  }
  0x12   :  { %346 = vsyncadd [#allocation6], 4294962944 }
  0x13   :  { %347 = dma.done.wait [#allocation9], 48  }
  0x14   :  { %348 = vsyncadd [#allocation9], 4294967248  ;;  %v79_v0 = vld [vmem:[#allocation5 + $0x8] sm:$0xff]  ;;  %v78_v1 = vld [vmem:[#allocation5] sm:$0xff]  ;;  %vm84_vm0 = vcmask 130048   ;;  %s359_s2 = smov [#allocation10]  }
  0x15   :  { %102 = vmatpush.msra.mxu0 %v79_v0  ;;  %v77_v2 = vld [vmem:[#allocation2] sm:$0xff]  ;;  %v124_v3 = vld [vmem:[#allocation7 + $0xf0] sm:$0xff]  ;;  %v123_v4 = vld [vmem:[#allocation7 + $0xe0] sm:$0xff]  ;;  %s196_s3 = sshll.u32 %s359_s2, 4  ;;  %s198_s13 = sshll.u32 %s404_s4, 4  ;;  %s197_s3 = int_to_ptr.vmem [resolvable:$true] %s196_s3  ;;  %s199_s13 = int_to_ptr.hbm [resolvable:$true] %s198_s13 }
  0x16   :  { %129 = vmatpush.msra.mxu1 %v124_v3  ;;  %v122_v5 = vld [vmem:[#allocation7 + $0xd0] sm:$0xff]  ;;  %v121_v6 = vld [vmem:[#allocation7 + $0xc0] sm:$0xff]  ;;  %v165_v19 = vld [vmem:[#allocation7 + $0xf8] sm:$0xff] }
  0x17   :  { %103 = vmatpush.msra.mxu0 %v78_v1  ;;  %v120_v7 = vld [vmem:[#allocation7 + $0xb0] sm:$0xff]  ;;  %v119_v8 = vld [vmem:[#allocation7 + $0xa0] sm:$0xff]  ;;  %v164_v20 = vld [vmem:[#allocation7 + $0xe8] sm:$0xff]  ;;  %170 = vmatpush.msra.mxu2 %v165_v19 }
  0x18   :  { %210 = vmatmul.msk.f32.vlgmr.msra.gmra.mxu0 %vm84_vm0, %v77_v2  ;;  %130 = vmatpush.msra.mxu1 %v123_v4  ;;  %v118_v9 = vld [vmem:[#allocation7 + $0x90] sm:$0xff]  ;;  %v117_v10 = vld [vmem:[#allocation7 + $0x80] sm:$0xff]  ;;  %v163_v21 = vld [vmem:[#allocation7 + $0xd8] sm:$0xff] }
  0x19   :  { %v116_v11 = vld [vmem:[#allocation7 + $0x70] sm:$0xff]  ;;  %v115_v12 = vld [vmem:[#allocation7 + $0x60] sm:$0xff]  ;;  %171 = vmatpush.msra.mxu2 %v164_v20  ;;  %v162_v22 = vld [vmem:[#allocation7 + $0xc8] sm:$0xff] }
  0x1a   :  { %131 = vmatpush.msra.mxu1 %v122_v5  ;;  %v114_v13 = vld [vmem:[#allocation7 + $0x50] sm:$0xff]  ;;  %v113_v14 = vld [vmem:[#allocation7 + $0x40] sm:$0xff]  ;;  %v161_v23 = vld [vmem:[#allocation7 + $0xb8] sm:$0xff] }
  0x1b   :  { %v112_v15 = vld [vmem:[#allocation7 + $0x30] sm:$0xff]  ;;  %v111_v16 = vld [vmem:[#allocation7 + $0x20] sm:$0xff]  ;;  %172 = vmatpush.msra.mxu2 %v163_v21  ;;  %v160_v24 = vld [vmem:[#allocation7 + $0xa8] sm:$0xff] }
  0x1c   :  { %132 = vmatpush.msra.mxu1 %v121_v6  ;;  %v110_v17 = vld [vmem:[#allocation7 + $0x10] sm:$0xff]  ;;  %v109_v18 = vld [vmem:[#allocation7] sm:$0xff]  ;;  %v159_v25 = vld [vmem:[#allocation7 + $0x98] sm:$0xff] }
  0x1d   :  { %173 = vmatpush.msra.mxu2 %v162_v22  ;;  %v158_v26 = vld [vmem:[#allocation7 + $0x88] sm:$0xff]  ;;  %v157_v27 = vld [vmem:[#allocation7 + $0x78] sm:$0xff]  ;;  %v220_v32 = vld [vmem:[#allocation8] ss:$0 sm:$0xff] }
  0x1e   :  { %133 = vmatpush.msra.mxu1 %v120_v7  ;;  %v156_v28 = vld [vmem:[#allocation7 + $0x68] sm:$0xff]  ;;  %v155_v29 = vld [vmem:[#allocation7 + $0x58] sm:$0xff]  ;;  %v221_v39 = vld [vmem:[#allocation8 + $0x1] ss:$0 sm:$0xff] }
  0x1f   :  { %174 = vmatpush.msra.mxu2 %v161_v23  ;;  %v154_v30 = vld [vmem:[#allocation7 + $0x48] sm:$0xff]  ;;  %v153_v31 = vld [vmem:[#allocation7 + $0x38] sm:$0xff]  ;;  %v222_v43 = vld [vmem:[#allocation8 + $0x2] ss:$0 sm:$0xff] }
  0x20   :  { %134 = vmatpush.msra.mxu1 %v119_v8  ;;  %v152_v36 = vld [vmem:[#allocation7 + $0x28] sm:$0xff]  ;;  %v151_v37 = vld [vmem:[#allocation7 + $0x18] sm:$0xff] }
  0x21   :  { %175 = vmatpush.msra.mxu2 %v160_v24  ;;  %v150_v38 = vld [vmem:[#allocation7 + $0x8] sm:$0xff] }
  0x22   :  { %135 = vmatpush.msra.mxu1 %v118_v9 }
  0x23   :  { %176 = vmatpush.msra.mxu2 %v159_v25 }
  0x24   :  { %136 = vmatpush.msra.mxu1 %v117_v10 }
  0x25   :  { %177 = vmatpush.msra.mxu2 %v158_v26 }
  0x26   :  { %137 = vmatpush.msra.mxu1 %v116_v11 }
  0x27   :  { %178 = vmatpush.msra.mxu2 %v157_v27 }
  0x28   :  { %138 = vmatpush.msra.mxu1 %v115_v12 }
  0x29   :  { %179 = vmatpush.msra.mxu2 %v156_v28 }
  0x2a   :  { %139 = vmatpush.msra.mxu1 %v114_v13 }
  0x2b   :  { %180 = vmatpush.msra.mxu2 %v155_v29 }
  0x2c   :  { %140 = vmatpush.msra.mxu1 %v113_v14 }
  0x2d   :  { %181 = vmatpush.msra.mxu2 %v154_v30 }
  0x2e   :  { %141 = vmatpush.msra.mxu1 %v112_v15 }
  0x2f   :  { %182 = vmatpush.msra.mxu2 %v153_v31 }
  0x30   :  { %142 = vmatpush.msra.mxu1 %v111_v16 }
  0x31   :  { %183 = vmatpush.msra.mxu2 %v152_v36 }
  0x32   :  { %143 = vmatpush.msra.mxu1 %v110_v17 }
  0x33   :  { %184 = vmatpush.msra.mxu2 %v151_v37 }
  0x34   :  { %144 = vmatpush.msra.mxu1 %v109_v18 }
  0x35   :  { %185 = vmatpush.msra.mxu2 %v150_v38 }
  0x95   :  { %v105_v33 = vpop.f32.mrf.mxu0 }
  0x96   :  { %v106_v34 = vadd.f32 %v220_v32, %v105_v33 }
  0x98   :  { %v108_v35 = vmax.f32 %v106_v34, 0.0 }
  0x9a   :  { %145 = vmatmul.f32.vlgmr.msra.gmra.mxu1 %v108_v35 }
 0x117   :  { %v146_v40 = vpop.f32.mrf.mxu1 }
 0x118   :  { %v147_v41 = vadd.f32 %v221_v39, %v146_v40 }
 0x11a   :  { %v149_v42 = vmax.f32 %v147_v41, 0.0 }
 0x11c   :  { %186 = vmatmul.f32.vlgmr.msra.gmra.mxu2 %v149_v42 }
 0x19f   :  { %v187_v44 = vpop.f32.mrf.mxu2 }
 0x1a0   :  { %v188_v45 = vadd.f32 %v222_v43, %v187_v44 }
 0x1a2   :  { %190 = vst [vmem:[#allocation10] sm:$0xff] %v188_v45 }
 0x1a3   :  { %201 = dma.vmem_to_hbm [thread:$0]  %s197_s3, 128, %s199_s13, [#allocation4]  }
 0x1a4   :  { %349 = dma.done.wait [#allocation4], 128  }
 0x1a5   :  { %350 = vsyncadd [#allocation4], 4294967168 }
 0x1a6   :  { %206 = vsyncpa [#allocation3], 1 }
 0x1a7   :  { %207 = vsyncpa [#allocation6], 1 }
 0x1a8   :  { %208 = vsyncpa [#allocation9], 1 }
 0x1a9   :  { %209 = vsyncpa [#allocation4], 1 }

</bundles_post_ra>
